<compile_context>
chip_gen: v6e
topology: v6e:2x2x1
jax: 0.10.0
libtpu: 0.0.40
codegen_flags: <defaults>
</compile_context>

<pallas_src>
import jax
import jax.numpy as jnp
from jax.experimental import pallas as pl
from jax.experimental.pallas import tpu as pltpu


# ----------------------------------------------------------------------------
# Kernel
# ----------------------------------------------------------------------------
def _identity_kernel(x_ref, o_ref):
    # Whole-array VMEM block in, whole-array VMEM block out (output aliases input).
    o_ref[...] = x_ref[...]


# ----------------------------------------------------------------------------
# Wrappers
# ----------------------------------------------------------------------------
def identity(x):
    """The true Identity: return the input unchanged. No kernel launched."""
    return x


def identity_pallas(x):
    """Single pass-through pallas_call (demonstration / forced-kernel path).

    Presents the data as a lane-dense 2D slab (rows, 128) when possible so the
    copy lowers to unmasked vld/vst, and aliases the output buffer onto the
    input buffer so no extra HBM allocation or round-trip is introduced.
    """
    orig_shape = x.shape
    n = x.size
    if n % 128 == 0:
        flat = x.reshape(n // 128, 128)      # lane-dense, sublane-friendly view
    else:
        flat = x.reshape(1, n)               # fallback: full-extent block

    out = pl.pallas_call(
        _identity_kernel,
        out_shape=jax.ShapeDtypeStruct(flat.shape, flat.dtype),
        in_specs=[pl.BlockSpec(memory_space=pltpu.VMEM)],
        out_specs=pl.BlockSpec(memory_space=pltpu.VMEM),
        input_output_aliases={0: 0},         # output HBM buffer == input buffer
    )(flat)
    return out.reshape(orig_shape)


# ----------------------------------------------------------------------------
if __name__ == "__main__":
    key = jax.random.PRNGKey(0)
    # Small shape consistent with the module: batch=2, channels=4, 16x16 spatial.
    x = jax.random.normal(key, (2, 4, 16, 16), jnp.float32)

    # Optimal path: no kernel at all.
    y_ref = identity(x)

    # Pallas pass-through path (jitted once, run once, blocked on).
    y = jax.jit(identity_pallas)(x)
    jax.block_until_ready(y)

    assert y.shape == x.shape and y.dtype == x.dtype
    assert bool(jnp.all(y == x)) and bool(jnp.all(y_ref == x))
    print("KERNEL_OK")
</pallas_src>

<mosaic_0001>
module attributes {stable_mosaic.version = 11 : i64} {
  func.func @_identity_kernel(%arg0: memref<16x128xf32, #tpu.memory_space<vmem>>, %arg1: memref<16x128xf32, #tpu.memory_space<vmem>>) attributes {dimension_semantics = [], scalar_prefetch = 0 : i64, scratch_operands = 0 : i64, tpu.core_type = #tpu.core_type<tc>} {
    %c0 = arith.constant 0 : index
    %c0_0 = arith.constant 0 : index
    %0 = vector.load %arg0[%c0, %c0_0] : memref<16x128xf32, #tpu.memory_space<vmem>>, vector<16x128xf32>
    %c0_1 = arith.constant 0 : index
    %c0_2 = arith.constant 0 : index
    %1 = vector.load %arg1[%c0_1, %c0_2] : memref<16x128xf32, #tpu.memory_space<vmem>>, vector<16x128xf32>
    tpu.vector_store %arg1[%c0_1, %c0_2], %0 {strides = array<i32>} : memref<16x128xf32, #tpu.memory_space<vmem>>, vector<16x128xf32>,
    return
  }
}

</mosaic_0001>

<bundles_post_ra>
// kernel: identity_pallas.1
= control target key start
LH: loop header
LB: loop body
LE: loop exit
PB: predicated region body
PF: predicated region fallthrough
CT: control target
= control target key end

     0   :  { %s38_s0 = inlined_call_operand.vmem [shape: f32[16,128], index: 0, kind: input, shape index: {}, may-alias: {0,1}]   ;;  %s39_s1 = inlined_call_operand.vmem [shape: f32[16,128], index: 1, kind: output, shape index: {}, may-alias: {0,1}]  }
   0x1   :  { %v8_v0 = vld [vmem:[%s38_s0] sm:$0xff]  ;;  %v9_v1 = vld [vmem:[%s38_s0 + $0x8] sm:$0xff] }
   0x2   :  { %10 = vst [vmem:[%s39_s1] sm:$0xff] %v8_v0  ;;  %11 = vst [vmem:[%s39_s1 + $0x8] sm:$0xff] %v9_v1 }

</bundles_post_ra>
